<compile_context>
chip_gen: v6e
topology: v6e:2x2x1
jax: 0.10.0
libtpu: 0.0.40
codegen_flags: <defaults>
</compile_context>

<pallas_src>
import functools

import jax
import jax.numpy as jnp
from jax import lax
from jax.experimental import pallas as pl
from jax.experimental.pallas import tpu as pltpu

LN_EPS = 1e-5                      # PyTorch nn.LayerNorm default eps
_INV_SQRT2 = 0.7071067811865476


def _round_up(x, m):
    return ((x + m - 1) // m) * m


def _default_config():
    """(row_tile, h_tile, vmem_limit_bytes) tuned per TPU generation."""
    row_tile, h_tile, vmem_limit = 768, 512, 100 * 1024 * 1024   # v5e / v6e (128 MiB VMEM)
    try:
        info = pltpu.get_tpu_info()
        vmem_cap = getattr(info, "vmem_capacity_bytes", None)
        if vmem_cap is not None and vmem_cap <= 64 * 1024 * 1024:
            # v7x: 64 MiB physical -- leave headroom for Mosaic internal scratch.
            row_tile, h_tile, vmem_limit = 512, 512, 48 * 1024 * 1024
    except Exception:
        # Conservative fallback that is safe on every generation.
        row_tile, h_tile, vmem_limit = 256, 512, 48 * 1024 * 1024
    return row_tile, h_tile, vmem_limit


def _ff_kernel(x_ref, gamma_ref, beta_ref, w1_ref, b1_ref, w2_ref, b2_ref,
               o_ref, xn_ref, acc_ref, *, d_true, d_pad, ln_eps):
    """Grid = (row_tiles, hidden_tiles); hidden axis is the reduction axis."""
    h_idx = pl.program_id(1)

    # --- once per row tile: LayerNorm (f32 math), stash result, zero accumulator ---
    @pl.when(h_idx == 0)
    def _():
        x = x_ref[...].astype(jnp.float32)
        inv_d = jnp.float32(1.0 / d_true)
        mean = jnp.sum(x, axis=-1, keepdims=True) * inv_d
        centered = x - mean
        if d_pad != d_true:
            # Padded feature columns must not contribute to the variance.
            mask = lax.broadcasted_iota(jnp.int32, x.shape, 1) < d_true
            centered = jnp.where(mask, centered, 0.0)
        var = jnp.sum(centered * centered, axis=-1, keepdims=True) * inv_d
        xn = centered * lax.rsqrt(var + ln_eps)
        xn = xn * gamma_ref[...].astype(jnp.float32) + beta_ref[...].astype(jnp.float32)
        xn_ref[...] = xn.astype(xn_ref.dtype)
        acc_ref[...] = jnp.zeros_like(acc_ref)

    # --- Linear(dim -> th chunk of hidden), GELU, partial Linear(hidden -> dim) ---
    h = jnp.dot(xn_ref[...], w1_ref[0], preferred_element_type=jnp.float32)
    h = h + b1_ref[...].astype(jnp.float32)
    h = 0.5 * h * (1.0 + lax.erf(h * _INV_SQRT2))       # exact (erf) GELU, f32
    # Dropout(p=0.0) is the identity.
    # TODO(synk): non-zero dropout would need pltpu.prng_seed / prng_random_bits.
    acc_ref[...] += jnp.dot(h.astype(w2_ref.dtype), w2_ref[...],
                            preferred_element_type=jnp.float32)

    # --- once per row tile: add output bias and store (lane-dense) ---
    @pl.when(h_idx == pl.num_programs(1) - 1)
    def _():
        y = acc_ref[...] + b2_ref[...].astype(jnp.float32)
        o_ref[...] = y.astype(o_ref.dtype)


def prepare_params(gamma, beta, w1, b1, w2, b2, *, h_tile=None, use_bf16=True):
    """Pad / cast parameters once (hoist out of the per-call hot path).

    w1: (D, H), w2: (H, D)  -- i.e. nn.Linear.weight.T.
    """
    if h_tile is None:
        _, h_tile, _ = _default_config()

    D, H = w1.shape
    d_pad = _round_up(D, 128)
    h_pad = _round_up(H, 128)
    th = min(h_tile, h_pad)
    h_pad = _round_up(h_pad, th)                  # hidden dim divisible by th
    cdt = jnp.bfloat16 if use_bf16 else jnp.float32

    gamma_p = jnp.pad(gamma.reshape(1, D).astype(jnp.float32), ((0, 0), (0, d_pad - D)))
    beta_p = jnp.pad(beta.reshape(1, D).astype(jnp.float32), ((0, 0), (0, d_pad - D)))
    w1_p = jnp.pad(w1.astype(cdt), ((0, d_pad - D), (0, h_pad - H)))
    # Contiguous per-hidden-block layout: (h_pad // th, d_pad, th) so each block
    # is one dense DMA slab instead of a strided column slab.
    w1_blk = w1_p.reshape(d_pad, h_pad // th, th).transpose(1, 0, 2)
    b1_p = jnp.pad(b1.reshape(1, H).astype(jnp.float32), ((0, 0), (0, h_pad - H)))
    w2_p = jnp.pad(w2.astype(cdt), ((0, h_pad - H), (0, d_pad - D)))
    b2_p = jnp.pad(b2.reshape(1, D).astype(jnp.float32), ((0, 0), (0, d_pad - D)))

    return dict(D=D, H=H, d_pad=d_pad, h_pad=h_pad, th=th, cdt=cdt,
                gamma=gamma_p, beta=beta_p, w1=w1_blk, b1=b1_p, w2=w2_p, b2=b2_p)


def feed_forward(x, params, *, row_tile=None, vmem_limit=None, ln_eps=LN_EPS):
    """x: [B, N, D] -> [B, N, D] using pre-padded params from prepare_params()."""
    B, N, D = x.shape
    assert D == params["D"], "feature dim mismatch"
    M = B * N
    d_pad, h_pad, th, cdt = params["d_pad"], params["h_pad"], params["th"], params["cdt"]

    def_rt, _, def_vl = _default_config()
    if row_tile is None:
        row_tile = def_rt
    if vmem_limit is None:
        vmem_limit = def_vl

    # 8-aligned row tile, clamped to the actual row count (don't pad toy inputs).
    tm = min(row_tile, _round_up(M, 8))
    # Keep >= 2 row tiles when M is large enough so v7x's two TensorCores both
    # get work along the "parallel" axis.
    if M > 256 and _round_up(M, tm) // tm < 2:
        tm = _round_up((M + 1) // 2, 8)
    m_pad = _round_up(M, tm)

    # x stays in its input dtype (halves the x HBM read / VMEM block vs f32).
    x2d = x.reshape(M, D)
    if (m_pad, d_pad) != (M, D):
        x2d = jnp.pad(x2d, ((0, m_pad - M), (0, d_pad - D)))

    grid = (m_pad // tm, h_pad // th)
    n_row_tiles = grid[0]

    kernel = functools.partial(_ff_kernel, d_true=D, d_pad=d_pad, ln_eps=ln_eps)

    w1_blk, w2_p = params["w1"], params["w2"]
    weight_bytes = (w1_blk.size * w1_blk.dtype.itemsize
                    + w2_p.size * w2_p.dtype.itemsize)
    out_itemsize = jnp.dtype(x.dtype).itemsize
    cost = pl.CostEstimate(
        flops=4 * m_pad * d_pad * h_pad,                       # two matmuls
        transcendentals=m_pad * h_pad,                         # erf
        bytes_accessed=(x2d.size * x2d.dtype.itemsize          # x read once
                        + n_row_tiles * weight_bytes           # weights per row tile
                        + m_pad * d_pad * out_itemsize),       # output writeback
    )

    out2d = pl.pallas_call(
        kernel,
        out_shape=jax.ShapeDtypeStruct((m_pad, d_pad), x.dtype),
        grid_spec=pltpu.PrefetchScalarGridSpec(
            num_scalar_prefetch=0,
            grid=grid,
            in_specs=[
                pl.BlockSpec((tm, d_pad), lambda i, h: (i, 0)),      # x rows
                pl.BlockSpec((1, d_pad), lambda i, h: (0, 0)),       # gamma
                pl.BlockSpec((1, d_pad), lambda i, h: (0, 0)),       # beta
                pl.BlockSpec((1, d_pad, th), lambda i, h: (h, 0, 0)),  # w1 block (contiguous)
                pl.BlockSpec((1, th), lambda i, h: (0, h)),          # b1 chunk
                pl.BlockSpec((th, d_pad), lambda i, h: (h, 0)),      # w2 chunk
                pl.BlockSpec((1, d_pad), lambda i, h: (0, 0)),       # b2
            ],
            out_specs=pl.BlockSpec((tm, d_pad), lambda i, h: (i, 0)),
            scratch_shapes=[
                pltpu.VMEM((tm, d_pad), cdt),          # LayerNorm output (MXU input)
                pltpu.VMEM((tm, d_pad), jnp.float32),  # output accumulator
            ],
        ),
        compiler_params=pltpu.CompilerParams(
            dimension_semantics=("parallel", "arbitrary"),
            vmem_limit_bytes=vmem_limit,
        ),
        cost_estimate=cost,
    )(x2d, params["gamma"], params["beta"], params["w1"], params["b1"],
      params["w2"], params["b2"])

    return out2d[:M, :D].reshape(B, N, D).astype(x.dtype)


if __name__ == "__main__":
    # Small shapes consistent with the module: [B, N, dim], hidden_dim = 2*dim.
    B, N, dim, hidden_dim = 2, 8, 32, 64

    key = jax.random.PRNGKey(0)
    kx, kw1, kb1, kw2, kb2 = jax.random.split(key, 5)

    x = jax.random.normal(kx, (B, N, dim), dtype=jnp.float32)

    # Parameters (nn.LayerNorm default init; Linear weights stored as (in, out)).
    gamma = jnp.ones((dim,), dtype=jnp.float32)
    beta = jnp.zeros((dim,), dtype=jnp.float32)
    w1 = jax.random.normal(kw1, (dim, hidden_dim), dtype=jnp.float32) * 0.02
    b1 = jax.random.normal(kb1, (hidden_dim,), dtype=jnp.float32) * 0.01
    w2 = jax.random.normal(kw2, (hidden_dim, dim), dtype=jnp.float32) * 0.02
    b2 = jax.random.normal(kb2, (dim,), dtype=jnp.float32) * 0.01

    # Weight padding/casting is done once here (hoisted out of the hot path).
    params = prepare_params(gamma, beta, w1, b1, w2, b2)

    out = feed_forward(x, params)
    jax.block_until_ready(out)

    # Pure-JAX f32 reference (matches the PyTorch module).
    def ref(x):
        mean = jnp.mean(x, axis=-1, keepdims=True)
        var = jnp.mean((x - mean) ** 2, axis=-1, keepdims=True)
        xn = (x - mean) / jnp.sqrt(var + LN_EPS) * gamma + beta
        h = xn @ w1 + b1
        h = 0.5 * h * (1.0 + lax.erf(h / jnp.sqrt(2.0)))
        return h @ w2 + b2

    expected = ref(x)
    assert out.shape == (B, N, dim)
    # Tolerance loosened because the kernel feeds bf16 operands to the MXU
    # (expected quantization, f32 accumulation).
    assert jnp.allclose(out, expected, atol=2e-2, rtol=2e-2), "mismatch vs reference"

    print("KERNEL_OK")
</pallas_src>

<mosaic_0001>
module attributes {stable_mosaic.version = 11 : i64} {
  func.func @_ff_kernel(%arg0: i32, %arg1: i32, %arg2: memref<16x128xf32, #tpu.memory_space<vmem>>, %arg3: memref<1x128xf32, #tpu.memory_space<vmem>>, %arg4: memref<1x128xf32, #tpu.memory_space<vmem>>, %arg5: memref<1x128x128xbf16, #tpu.memory_space<vmem>>, %arg6: memref<1x128xf32, #tpu.memory_space<vmem>>, %arg7: memref<128x128xbf16, #tpu.memory_space<vmem>>, %arg8: memref<1x128xf32, #tpu.memory_space<vmem>>, %arg9: memref<16x128xf32, #tpu.memory_space<vmem>>, %arg10: memref<16x128xbf16, #tpu.memory_space<vmem>>, %arg11: memref<16x128xf32, #tpu.memory_space<vmem>>) attributes {dimension_semantics = [#tpu.dimension_semantics<parallel>, #tpu.dimension_semantics<arbitrary>], iteration_bounds = array<i64: 1, 1>, scalar_prefetch = 0 : i64, scratch_operands = 2 : i64, tpu.core_type = #tpu.core_type<tc>, window_params = [{transform_indices = @transform_0, window_bounds = array<i64: 16, 128>}, {pipeline_mode = #tpu.pipeline_mode<synchronous>, transform_indices = @transform_1, window_bounds = array<i64: 1, 128>}, {pipeline_mode = #tpu.pipeline_mode<synchronous>, transform_indices = @transform_2, window_bounds = array<i64: 1, 128>}, {transform_indices = @transform_3, window_bounds = array<i64: 1, 128, 128>}, {transform_indices = @transform_4, window_bounds = array<i64: 1, 128>}, {transform_indices = @transform_5, window_bounds = array<i64: 128, 128>}, {pipeline_mode = #tpu.pipeline_mode<synchronous>, transform_indices = @transform_6, window_bounds = array<i64: 1, 128>}, {transform_indices = @transform_7, window_bounds = array<i64: 16, 128>}]} {
    %c0_i32 = arith.constant 0 : i32
    %0 = arith.cmpi eq, %arg1, %c0_i32 : i32
    %1 = arith.extui %0 : i1 to i32
    %c0_i32_0 = arith.constant 0 : i32
    %2 = arith.cmpi ne, %1, %c0_i32_0 : i32
    scf.if %2 {
      %c0_19 = arith.constant 0 : index
      %c0_20 = arith.constant 0 : index
      %27 = vector.load %arg2[%c0_19, %c0_20] : memref<16x128xf32, #tpu.memory_space<vmem>>, vector<16x128xf32>
      %cst_21 = arith.constant dense<0.000000e+00> : vector<16xf32>
      %28 = vector.multi_reduction <add>, %27, %cst_21 [1] : vector<16x128xf32> to vector<16xf32>
      %29 = vector.shape_cast %28 : vector<16xf32> to vector<16x1xf32>
      %cst_22 = arith.constant 3.125000e-02 : f32
      %30 = vector.broadcast %cst_22 : f32 to vector<16x1xf32>
      %31 = arith.mulf %29, %30 : vector<16x1xf32>
      %32 = vector.broadcast %31 : vector<16x1xf32> to vector<16x128xf32>
      %33 = arith.subf %27, %32 : vector<16x128xf32>
      %34 = tpu.iota {dimensions = array<i32: 1>} : vector<16x128xi32>
      %c32_i32 = arith.constant 32 : i32
      %35 = vector.broadcast %c32_i32 : i32 to vector<16x128xi32>
      %36 = arith.cmpi slt, %34, %35 : vector<16x128xi32>
      %cst_23 = arith.constant 0.000000e+00 : f32
      %37 = vector.broadcast %cst_23 : f32 to vector<16x128xf32>
      %38 = arith.select %36, %33, %37 : vector<16x128xi1>, vector<16x128xf32>
      %39 = arith.mulf %38, %38 : vector<16x128xf32>
      %cst_24 = arith.constant dense<0.000000e+00> : vector<16xf32>
      %40 = vector.multi_reduction <add>, %39, %cst_24 [1] : vector<16x128xf32> to vector<16xf32>
      %41 = vector.shape_cast %40 : vector<16xf32> to vector<16x1xf32>
      %cst_25 = arith.constant 3.125000e-02 : f32
      %42 = vector.broadcast %cst_25 : f32 to vector<16x1xf32>
      %43 = arith.mulf %41, %42 : vector<16x1xf32>
      %cst_26 = arith.constant 9.99999974E-6 : f32
      %44 = vector.broadcast %cst_26 : f32 to vector<16x1xf32>
      %45 = arith.addf %43, %44 : vector<16x1xf32>
      %46 = math.rsqrt %45 : vector<16x1xf32>
      %47 = vector.broadcast %46 : vector<16x1xf32> to vector<16x128xf32>
      %48 = arith.mulf %38, %47 : vector<16x128xf32>
      %c0_27 = arith.constant 0 : index
      %c0_28 = arith.constant 0 : index
      %49 = vector.load %arg3[%c0_27, %c0_28] : memref<1x128xf32, #tpu.memory_space<vmem>>, vector<1x128xf32>
      %50 = vector.broadcast %49 : vector<1x128xf32> to vector<16x128xf32>
      %51 = arith.mulf %48, %50 : vector<16x128xf32>
      %c0_29 = arith.constant 0 : index
      %c0_30 = arith.constant 0 : index
      %52 = vector.load %arg4[%c0_29, %c0_30] : memref<1x128xf32, #tpu.memory_space<vmem>>, vector<1x128xf32>
      %53 = vector.broadcast %52 : vector<1x128xf32> to vector<16x128xf32>
      %54 = arith.addf %51, %53 : vector<16x128xf32>
      %55 = arith.truncf %54 : vector<16x128xf32> to vector<16x128xbf16>
      %c0_31 = arith.constant 0 : index
      %c0_32 = arith.constant 0 : index
      %56 = vector.load %arg10[%c0_31, %c0_32] : memref<16x128xbf16, #tpu.memory_space<vmem>>, vector<16x128xbf16>
      tpu.vector_store %arg10[%c0_31, %c0_32], %55 {strides = array<i32>} : memref<16x128xbf16, #tpu.memory_space<vmem>>, vector<16x128xbf16>,
      %cst_33 = arith.constant 0.000000e+00 : f32
      %57 = vector.broadcast %cst_33 : f32 to vector<16x128xf32>
      %c0_34 = arith.constant 0 : index
      %c0_35 = arith.constant 0 : index
      %58 = vector.load %arg11[%c0_34, %c0_35] : memref<16x128xf32, #tpu.memory_space<vmem>>, vector<16x128xf32>
      tpu.vector_store %arg11[%c0_34, %c0_35], %57 {strides = array<i32>} : memref<16x128xf32, #tpu.memory_space<vmem>>, vector<16x128xf32>,
    } else {
    }
    %c0 = arith.constant 0 : index
    %c0_1 = arith.constant 0 : index
    %3 = vector.load %arg10[%c0, %c0_1] : memref<16x128xbf16, #tpu.memory_space<vmem>>, vector<16x128xbf16>
    %c0_2 = arith.constant 0 : index
    %c0_3 = arith.constant 0 : index
    %c0_4 = arith.constant 0 : index
    %4 = vector.load %arg5[%c0_2, %c0_3, %c0_4] : memref<1x128x128xbf16, #tpu.memory_space<vmem>>, vector<1x128x128xbf16>
    %5 = vector.shape_cast %4 : vector<1x128x128xbf16> to vector<128x128xbf16>
    %cst = arith.constant dense<0.000000e+00> : vector<16x128xf32>
    %6 = tpu.matmul %3, %5, %cst {dimension_numbers = #tpu.dot_dimension_numbers<[1], [0], [0], [1], [0, 0, 1, 1], [], []>} : vector<16x128xbf16>, vector<128x128xbf16>, vector<16x128xf32> -> vector<16x128xf32>
    %c0_5 = arith.constant 0 : index
    %c0_6 = arith.constant 0 : index
    %7 = vector.load %arg6[%c0_5, %c0_6] : memref<1x128xf32, #tpu.memory_space<vmem>>, vector<1x128xf32>
    %8 = vector.broadcast %7 : vector<1x128xf32> to vector<16x128xf32>
    %9 = arith.addf %6, %8 : vector<16x128xf32>
    %cst_7 = arith.constant 5.000000e-01 : f32
    %10 = vector.broadcast %cst_7 : f32 to vector<16x128xf32>
    %11 = arith.mulf %10, %9 : vector<16x128xf32>
    %cst_8 = arith.constant 0.707106769 : f32
    %12 = vector.broadcast %cst_8 : f32 to vector<16x128xf32>
    %13 = arith.mulf %9, %12 : vector<16x128xf32>
    %14 = math.erf %13 : vector<16x128xf32>
    %cst_9 = arith.constant 1.000000e+00 : f32
    %15 = vector.broadcast %cst_9 : f32 to vector<16x128xf32>
    %16 = arith.addf %15, %14 : vector<16x128xf32>
    %17 = arith.mulf %11, %16 : vector<16x128xf32>
    %c0_10 = arith.constant 0 : index
    %c0_11 = arith.constant 0 : index
    %18 = vector.load %arg11[%c0_10, %c0_11] : memref<16x128xf32, #tpu.memory_space<vmem>>, vector<16x128xf32>
    %19 = arith.truncf %17 : vector<16x128xf32> to vector<16x128xbf16>
    %c0_12 = arith.constant 0 : index
    %c0_13 = arith.constant 0 : index
    %20 = vector.load %arg7[%c0_12, %c0_13] : memref<128x128xbf16, #tpu.memory_space<vmem>>, vector<128x128xbf16>
    %cst_14 = arith.constant dense<0.000000e+00> : vector<16x128xf32>
    %21 = tpu.matmul %19, %20, %cst_14 {dimension_numbers = #tpu.dot_dimension_numbers<[1], [0], [0], [1], [0, 0, 1, 1], [], []>} : vector<16x128xbf16>, vector<128x128xbf16>, vector<16x128xf32> -> vector<16x128xf32>
    %22 = arith.addf %18, %21 : vector<16x128xf32>
    %c0_15 = arith.constant 0 : index
    %c0_16 = arith.constant 0 : index
    %23 = vector.load %arg11[%c0_15, %c0_16] : memref<16x128xf32, #tpu.memory_space<vmem>>, vector<16x128xf32>
    tpu.vector_store %arg11[%c0_15, %c0_16], %22 {strides = array<i32>} : memref<16x128xf32, #tpu.memory_space<vmem>>, vector<16x128xf32>,
    %c0_i32_17 = arith.constant 0 : i32
    %24 = arith.cmpi eq, %arg1, %c0_i32_17 : i32
    %25 = arith.extui %24 : i1 to i32
    %c0_i32_18 = arith.constant 0 : i32
    %26 = arith.cmpi ne, %25, %c0_i32_18 : i32
    scf.if %26 {
      %c0_19 = arith.constant 0 : index
      %c0_20 = arith.constant 0 : index
      %27 = vector.load %arg11[%c0_19, %c0_20] : memref<16x128xf32, #tpu.memory_space<vmem>>, vector<16x128xf32>
      %c0_21 = arith.constant 0 : index
      %c0_22 = arith.constant 0 : index
      %28 = vector.load %arg8[%c0_21, %c0_22] : memref<1x128xf32, #tpu.memory_space<vmem>>, vector<1x128xf32>
      %29 = vector.broadcast %28 : vector<1x128xf32> to vector<16x128xf32>
      %30 = arith.addf %27, %29 : vector<16x128xf32>
      %c0_23 = arith.constant 0 : index
      %c0_24 = arith.constant 0 : index
      %31 = vector.load %arg9[%c0_23, %c0_24] : memref<16x128xf32, #tpu.memory_space<vmem>>, vector<16x128xf32>
      tpu.vector_store %arg9[%c0_23, %c0_24], %30 {strides = array<i32>} : memref<16x128xf32, #tpu.memory_space<vmem>>, vector<16x128xf32>,
    } else {
    }
    return
  }
  func.func @transform_0(%arg0: i32, %arg1: i32) -> (i32, i32) {
    %c0_i32 = arith.constant 0 : i32
    %c0_i32_0 = arith.constant 0 : i32
    return %arg0, %c0_i32 : i32, i32
  }
  func.func @transform_1(%arg0: i32, %arg1: i32) -> (i32, i32) {
    %c0_i32 = arith.constant 0 : i32
    %c0_i32_0 = arith.constant 0 : i32
    %c0_i32_1 = arith.constant 0 : i32
    return %c0_i32, %c0_i32_0 : i32, i32
  }
  func.func @transform_2(%arg0: i32, %arg1: i32) -> (i32, i32) {
    %c0_i32 = arith.constant 0 : i32
    %c0_i32_0 = arith.constant 0 : i32
    %c0_i32_1 = arith.constant 0 : i32
    return %c0_i32, %c0_i32_0 : i32, i32
  }
  func.func @transform_3(%arg0: i32, %arg1: i32) -> (i32, i32, i32) {
    %c0_i32 = arith.constant 0 : i32
    %c0_i32_0 = arith.constant 0 : i32
    %c0_i32_1 = arith.constant 0 : i32
    return %arg1, %c0_i32, %c0_i32_0 : i32, i32, i32
  }
  func.func @transform_4(%arg0: i32, %arg1: i32) -> (i32, i32) {
    %c0_i32 = arith.constant 0 : i32
    %c0_i32_0 = arith.constant 0 : i32
    return %c0_i32, %arg1 : i32, i32
  }
  func.func @transform_5(%arg0: i32, %arg1: i32) -> (i32, i32) {
    %c0_i32 = arith.constant 0 : i32
    %c0_i32_0 = arith.constant 0 : i32
    return %arg1, %c0_i32 : i32, i32
  }
  func.func @transform_6(%arg0: i32, %arg1: i32) -> (i32, i32) {
    %c0_i32 = arith.constant 0 : i32
    %c0_i32_0 = arith.constant 0 : i32
    %c0_i32_1 = arith.constant 0 : i32
    return %c0_i32, %c0_i32_0 : i32, i32
  }
  func.func @transform_7(%arg0: i32, %arg1: i32) -> (i32, i32) {
    %c0_i32 = arith.constant 0 : i32
    %c0_i32_0 = arith.constant 0 : i32
    return %arg0, %c0_i32 : i32, i32
  }
}

</mosaic_0001>

<bundles_post_ra>
// kernel: tpu_custom_call.1
= control target key start
LH: loop header
LB: loop body
LE: loop exit
PB: predicated region body
PF: predicated region fallthrough
CT: control target
= control target key end

     0   :  { %12 = vsyncpa [#allocation5], 0  ;;  %s715_s0 = inlined_call_operand.hbm [shape: f32[16,128], index: 0, kind: input, shape index: {}]   ;;  %s716_s1 = inlined_call_operand.vmem [shape: f32[1,128], index: 1, kind: input, shape index: {}]   ;;  %s717_s2 = inlined_call_operand.vmem [shape: f32[1,128], index: 2, kind: input, shape index: {}]   ;;  %s718_s3 = inlined_call_operand.hbm [shape: bf16[1,128,128], index: 3, kind: input, shape index: {}]   ;;  %s719_s4 = inlined_call_operand.vmem [shape: f32[1,128], index: 4, kind: input, shape index: {}]   ;;  %s720_s5 = inlined_call_operand.hbm [shape: bf16[128,128], index: 5, kind: input, shape index: {}]   ;;  %s721_s6 = inlined_call_operand.vmem [shape: f32[1,128], index: 6, kind: input, shape index: {}]   ;;  %s722_s7 = inlined_call_operand.hbm [shape: f32[16,128], index: 7, kind: output, shape index: {}]  }
   0x1   :  { %13 = vsyncpa [#allocation8], 0 }
   0x2   :  { %14 = vsyncpa [#allocation6], 0  ;;  %s617_s24 = smov [#allocation7]  }
   0x3   :  { %s36_s25 = sshll.u32 %s617_s24, 4  ;;  %s37_s25 = int_to_ptr.vmem [resolvable:$true] %s36_s25 }
   0x4   :  { %s539_s26 = scalar_lea.vmem %s37_s25, 1024  ;;  %p544_p1 = scmp.lt.s32.totalorder %s37_s25, %s37_s25 }
   0x5   :  { %p540_p0 = scmp.ne.s32.totalorder %s37_s25, %s539_s26  ;;  %p545_p2 = scmp.lt.s32.totalorder %s539_s26, %s539_s26 }
   0x7   :  { %p546_p3 = por %p545_p2, %p544_p1 }
   0x9   :  { %p547_p4 = pnand %p546_p3, %p540_p0 }
   0xb   :  { %550 = shalt.err (!%p547_p4)
}
   0xc   :  { %s618_s27 = smov 64   ;;  %s619_s28 = smov 4  }
   0xd   :  { %42 = dma.hbm_to_vmem [thread:$0]  %s718_s3, 1024, %s37_s25, [#allocation8], %s618_s27, %s618_s27, %s619_s28  }
   0xe   :  { %s620_s8 = smov [#allocation4]  }
   0xf   :  { %s20_s9 = sshll.u32 %s620_s8, 4  ;;  %s21_s9 = int_to_ptr.vmem [resolvable:$true] %s20_s9 }
  0x10   :  { %s559_s10 = scalar_lea.vmem %s21_s9, 256  ;;  %p564_p6 = scmp.lt.s32.totalorder %s21_s9, %s21_s9 }
  0x11   :  { %p560_p5 = scmp.ne.s32.totalorder %s21_s9, %s559_s10  ;;  %p565_p7 = scmp.lt.s32.totalorder %s559_s10, %s559_s10 }
  0x13   :  { %p566_p8 = por %p565_p7, %p564_p6 }
  0x15   :  { %p567_p9 = pnand %p566_p8, %p560_p5 }
  0x17   :  { %570 = shalt.err (!%p567_p9)
}
  0x18   :  { %s621_s11 = smov 128   ;;  %s622_s12 = smov 8  }
  0x19   :  { %26 = dma.hbm_to_vmem [thread:$0]  %s715_s0, 256, %s21_s9, [#allocation5], %s621_s11, %s621_s11, %s622_s12  }
  0x1a   :  { %s623_s3 = smov [#allocation9]  }
  0x1b   :  { %s50_s15 = sshll.u32 %s623_s3, 4  ;;  %s51_s15 = int_to_ptr.vmem [resolvable:$true] %s50_s15 }
  0x1c   :  { %s579_s16 = scalar_lea.vmem %s51_s15, 1024  ;;  %p584_p11 = scmp.lt.s32.totalorder %s51_s15, %s51_s15 }
  0x1d   :  { %p580_p10 = scmp.ne.s32.totalorder %s51_s15, %s579_s16  ;;  %p585_p12 = scmp.lt.s32.totalorder %s579_s16, %s579_s16 }
  0x1f   :  { %p586_p13 = por %p585_p12, %p584_p11 }
  0x21   :  { %p587_p0 = pnand %p586_p13, %p580_p10 }
  0x23   :  { %590 = shalt.err (!%p587_p0)
}
  0x24   :  { %56 = dma.hbm_to_vmem [thread:$0]  %s720_s5, 1024, %s51_s15, [#allocation8], %s618_s27, %s618_s27, %s619_s28  }
  0x25   :  { %611 = dma.done.wait [#allocation5], 256  }
  0x26   :  { %612 = vsyncadd [#allocation5], 4294967040 }
  0x27   :  { %613 = dma.done.wait [#allocation8], 2048  }
  0x28   :  { %614 = vsyncadd [#allocation8], 4294965248  ;;  %v73_v0 = vld [vmem:[#allocation4] sm:$0xff]  ;;  %v74_v1 = vld [vmem:[#allocation4 + $0x8] sm:$0xff]  ;;  %v83_v2 = vlaneseq  ;;  %v624_v15 = vmov 0.0   ;;  %vm625_vm1 = vmmov 0  }
  0x29   :  { %75 = vadd.xlane.f32.xlu0 %v73_v0  ;;  %v506_v14 = vld [vmem:[#allocation7 + $0x38] sm:$0xff]   ;;  %456 = vmatprep.subr.bf16.mxu0 %v624_v15  ;;  %v507_v16 = vld [vmem:[#allocation7 + $0x30] sm:$0xff]   ;;  %v508_v17 = vld [vmem:[#allocation7 + $0x28] sm:$0xff]   ;;  %s626_s22 = smov [#allocation10]  }
  0x2a   :  { %v84_v3 = vand.u32 127, %v83_v2  ;;  %476 = vmatprep.subr.bf16.mxu1 %v624_v15  ;;  %457 = vmatpush3.bf16.msra.mxu0 %v506_v14  ;;  %v509_v18 = vld [vmem:[#allocation7 + $0x20] sm:$0xff]   ;;  %v510_v19 = vld [vmem:[#allocation7 + $0x18] sm:$0xff]   ;;  %v511_v20 = vld [vmem:[#allocation7 + $0x10] sm:$0xff]   ;;  %s395_s23 = sshll.u32 %s626_s22, 4  ;;  %s396_s23 = int_to_ptr.vmem [resolvable:$true] %s395_s23 }
  0x2b   :  { %458 = vmatprep.subr.bf16.mxu0 %v624_v15  ;;  %v512_v21 = vld [vmem:[#allocation7 + $0x8] sm:$0xff]   ;;  %472 = vmatprep.mubr.msk.bf16.mxu0 %vm625_vm1, %v624_v15  ;;  %v513_v22 = vld [vmem:[#allocation7] sm:$0xff]   ;;  %v515_v23 = vld [vmem:[#allocation9 + $0x38] sm:$0xff]   ;;  %s591_s24 = scalar_lea.vmem %s396_s23, 256  ;;  %p596_p2 = scmp.lt.s32.totalorder %s396_s23, %s396_s23 }
  0x2c   :  { %vm85_vm0 = vcmp.lt.s32.totalorder %v84_v3, 32  ;;  %492 = vmatprep.mubr.msk.bf16.mxu1 %vm625_vm1, %v624_v15  ;;  %477 = vmatpush3.bf16.msra.mxu1 %v515_v23  ;;  %v408_v32 = vld [vmem:[%s716_s1] ss:$0 sm:$0xff]  ;;  %v516_v42 = vld [vmem:[#allocation9 + $0x30] sm:$0xff]   ;;  %v518_v44 = vld [vmem:[#allocation9 + $0x20] sm:$0xff]   ;;  %p592_p1 = scmp.ne.s32.totalorder %s396_s23, %s591_s24  ;;  %p597_p3 = scmp.lt.s32.totalorder %s591_s24, %s591_s24 }
  0x2d   :  { %77 = vadd.xlane.f32.xlu0 %v74_v1  ;;  %478 = vmatprep.subr.bf16.mxu1 %v624_v15  ;;  %v409_v36 = vld [vmem:[%s717_s2] ss:$0 sm:$0xff]  ;;  %v519_v45 = vld [vmem:[#allocation9 + $0x18] sm:$0xff]   ;;  %v520_v46 = vld [vmem:[#allocation9 + $0x10] sm:$0xff]  }
  0x2e   :  { %459 = vmatpush3.bf16.msra.mxu0 %v507_v16  ;;  %v517_v43 = vld [vmem:[#allocation9 + $0x28] sm:$0xff]   ;;  %v522_v48 = vld [vmem:[#allocation9] sm:$0xff]   ;;  %p598_p4 = por %p597_p3, %p596_p2 }
  0x2f   :  { %460 = vmatprep.subr.bf16.mxu0 %v624_v15  ;;  %v521_v47 = vld [vmem:[#allocation9 + $0x8] sm:$0xff]  }
  0x30   :  { %479 = vmatpush3.bf16.msra.mxu1 %v516_v42  ;;  %v412_v49 = vld [vmem:[%s719_s4] ss:$0 sm:$0xff]  ;;  %p599_p5 = pnand %p598_p4, %p592_p1 }
  0x31   :  { %480 = vmatprep.subr.bf16.mxu1 %v624_v15  ;;  %v430_v3 = vld [vmem:[%s721_s6] ss:$0 sm:$0xff] }
  0x32   :  { %461 = vmatpush3.bf16.msra.mxu0 %v508_v17 }
  0x33   :  { %462 = vmatprep.subr.bf16.mxu0 %v624_v15 }
  0x34   :  { %481 = vmatpush3.bf16.msra.mxu1 %v517_v43 }
  0x35   :  { %482 = vmatprep.subr.bf16.mxu1 %v624_v15 }
  0x36   :  { %463 = vmatpush3.bf16.msra.mxu0 %v509_v18 }
  0x37   :  { %464 = vmatprep.subr.bf16.mxu0 %v624_v15 }
  0x38   :  { %483 = vmatpush3.bf16.msra.mxu1 %v518_v44 }
  0x39   :  { %484 = vmatprep.subr.bf16.mxu1 %v624_v15 }
  0x3a   :  { %465 = vmatpush3.bf16.msra.mxu0 %v510_v19 }
  0x3b   :  { %466 = vmatprep.subr.bf16.mxu0 %v624_v15 }
  0x3c   :  { %485 = vmatpush3.bf16.msra.mxu1 %v519_v45 }
  0x3d   :  { %486 = vmatprep.subr.bf16.mxu1 %v624_v15 }
  0x3e   :  { %467 = vmatpush3.bf16.msra.mxu0 %v511_v20 }
  0x3f   :  { %468 = vmatprep.subr.bf16.mxu0 %v624_v15 }
  0x40   :  { %487 = vmatpush3.bf16.msra.mxu1 %v520_v46 }
  0x41   :  { %488 = vmatprep.subr.bf16.mxu1 %v624_v15 }
  0x42   :  { %469 = vmatpush3.bf16.msra.mxu0 %v512_v21 }
  0x43   :  { %470 = vmatprep.subr.bf16.mxu0 %v624_v15 }
  0x44   :  { %489 = vmatpush3.bf16.msra.mxu1 %v521_v47 }
  0x45   :  { %490 = vmatprep.subr.bf16.mxu1 %v624_v15 }
  0x46   :  { %471 = vmatpush3.bf16.msra.mxu0 %v513_v22 }
  0x48   :  { %491 = vmatpush3.bf16.msra.mxu1 %v522_v48 }
  0xb2   :  { %v76_v4 = vpop.xlane.xlu0 %75 }
  0xb3   :  { %v79_v5 = vmul.f32 0.03125, %v76_v4 }
  0xb5   :  { %v81_v6 = vsub.f32 %v73_v0, %v79_v5 }
  0xb6   :  { %v78_v7 = vpop.xlane.xlu0 %77 }
  0xb7   :  { %v80_v8 = vmul.f32 0.03125, %v78_v7  ;;  %v86_v9 = vsel %vm85_vm0, %v81_v6, 0.0 }
  0xb8   :  { %v88_v10 = vmul.f32 %v86_v9, %v86_v9 }
  0xb9   :  { %v82_v11 = vsub.f32 %v74_v1, %v80_v8 }
  0xba   :  { %90 = vadd.xlane.f32.xlu1 %v88_v10 }
  0xbb   :  { %v87_v12 = vsel %vm85_vm0, %v82_v11, 0.0 }
  0xbc   :  { %v89_v13 = vmul.f32 %v87_v12, %v87_v12 }
  0xbe   :  { %92 = vadd.xlane.f32.xlu1 %v89_v13 }
 0x143   :  { %v91_v24 = vpop.xlane.xlu1 %90 }
 0x144   :  { %v94_v25 = vmul.f32 0.03125, %v91_v24 }
 0x146   :  { %v96_v26 = vadd.f32 1e-05, %v94_v25 }
 0x147   :  { %v93_v27 = vpop.xlane.xlu1 %92 }
 0x148   :  { %523 = vrsqrt.f32 %v96_v26  ;;  %v95_v28 = vmul.f32 0.03125, %v93_v27 }
 0x14a   :  { %v97_v29 = vadd.f32 1e-05, %v95_v28 }
 0x14c   :  { %525 = vrsqrt.f32 %v97_v29 }
 0x155   :  { %v524_v30 = vpop.eup %523 }
 0x156   :  { %v100_v31 = vmul.f32 %v524_v30, %v86_v9 }
 0x158   :  { %v109_v34 = vmul.f32 %v408_v32, %v100_v31 }
 0x159   :  { %v526_v33 = vpop.eup %525 }
 0x15a   :  { %v101_v35 = vmul.f32 %v526_v33, %v87_v12  ;;  %v118_v38 = vadd.f32 %v409_v36, %v109_v34 }
 0x15c   :  { %v110_v37 = vmul.f32 %v408_v32, %v101_v35 }
 0x15e   :  { %v119_v39 = vadd.f32 %v409_v36, %v110_v37 }
 0x160   :  { %v436_v40 = vpack.c.bf16 %v119_v39, %v118_v38 }
 0x162   :  { %437 = vst [vmem:[#allocation2] sm:$0xff] %v436_v40  }
 0x169   :  { %v514_v41 = vld [vmem:[#allocation2] sm:$0xff]  }
 0x16a   :  { %473 = vmatmul.mubr.bf16.vlgmr.msra.gmra.mxu0 %v514_v41 }
 0x22a   :  { %v245_v50 = vpop.f32.mrf.mxu0 }
 0x22b   :  { %v246_v51 = vadd.f32 %v412_v49, %v245_v50 }
 0x22c   :  { %v474_v52 = vpop.f32.mrf.mxu0 }
 0x22d   :  { %v254_v53 = vmul.f32 0.70710677, %v246_v51  ;;  %v252_v61 = vmul.f32 0.5, %v246_v51 }
 0x22e   :  { %v248_v54 = vpop.f32.mrf.mxu0 }
 0x22f   :  { %527 = verf.f32 %v254_v53  ;;  %v249_v55 = vadd.f32 %v412_v49, %v248_v54 }
 0x230   :  { %v475_v56 = vpop.f32.mrf.mxu0 }
 0x231   :  { %v255_v57 = vmul.f32 0.70710677, %v249_v55  ;;  %v253_v62 = vmul.f32 0.5, %v249_v55 }
 0x233   :  { %529 = verf.f32 %v255_v57 }
 0x23c   :  { %v528_v58 = vpop.eup %527 }
 0x23d   :  { %v258_v59 = vadd.f32 1.0, %v528_v58 }
 0x23f   :  { %v260_v0 = vmul.f32 %v258_v59, %v252_v61 }
 0x240   :  { %v530_v60 = vpop.eup %529 }
 0x241   :  { %v259_v63 = vadd.f32 1.0, %v530_v60 }
 0x243   :  { %v261_v1 = vmul.f32 %v259_v63, %v253_v62 }
 0x245   :  { %v264_v2 = vpack.c.bf16 %v261_v1, %v260_v0 }
 0x247   :  { %493 = vmatmul.mubr.bf16.vlgmr.msra.gmra.mxu1 %v264_v2 }
 0x307   :  { %v363_v4 = vpop.f32.mrf.mxu1 }
 0x308   :  { %v386_v5 = vadd.f32 %v430_v3, %v363_v4 }
 0x309   :  { %v494_v6 = vpop.f32.mrf.mxu1 }
 0x30a   :  { %388 = vst [vmem:[#allocation10] sm:$0xff] %v386_v5 }
 0x30b   :  { %v366_v7 = vpop.f32.mrf.mxu1 }
 0x30c   :  { %v387_v8 = vadd.f32 %v430_v3, %v366_v7 }
 0x30d   :  { %v495_v9 = vpop.f32.mrf.mxu1 }
 0x30e   :  { %389 = vst [vmem:[#allocation10 + $0x8] sm:$0xff] %v387_v8 }
 0x30f   :  { %602 = shalt.err (!%p599_p5)
}
 0x310   :  { %401 = dma.vmem_to_hbm [thread:$0]  %s396_s23, 256, %s722_s7, [#allocation6], %s621_s11, %s621_s11, %s622_s12  }
 0x311   :  { %615 = dma.done.wait [#allocation6], 256  }
 0x312   :  { %616 = vsyncadd [#allocation6], 4294967040 }
 0x313   :  { %405 = vsyncpa [#allocation5], 1 }
 0x314   :  { %406 = vsyncpa [#allocation8], 1 }
 0x315   :  { %407 = vsyncpa [#allocation6], 1 }

</bundles_post_ra>
